<compile_context>
chip_gen: v7x
topology: tpu7x:2x2x1
jax: 0.10.0
libtpu: 0.0.40
codegen_flags: <defaults>
</compile_context>

<pallas_src>
import functools

import jax
import jax.numpy as jnp
from jax.experimental import pallas as pl
from jax.experimental.pallas import tpu as pltpu


def _group_pointwise_kernel(x_ref, wt_ref, o_ref):
    # x_ref: (1, C, TS)   wt_ref: (N, C)   o_ref: (1, N, TS)
    o_ref[0] = jnp.dot(
        wt_ref[...], x_ref[0], preferred_element_type=jnp.float32
    ).astype(o_ref.dtype)


@functools.partial(jax.jit, static_argnames=("ts",))
def group_pointwise(x_nchw, w, *, ts=512):
    """x_nchw: (B, C, H, W); w: (C, n_heads, p) -> (B, n_heads, H, W, p)."""
    B, C, H, W = x_nchw.shape
    C_w, n_heads, p = w.shape
    assert C_w == C
    N = n_heads * p
    HW = H * W

    # Free reshapes / tiny transpose (weight is (C, N) -> (N, C), negligible).
    x3 = x_nchw.reshape(B, C, HW)           # native layout, no data movement
    wt = jnp.transpose(w.reshape(C, N))     # (N, C)

    if HW <= ts:
        # One lane-dense tile covering the full spatial extent per batch.
        ts_eff = HW
        grid_s = 1
    else:
        # Multiple-of-128 spatial tiles; Pallas masks the ragged last block.
        ts_eff = ts
        assert ts_eff % 128 == 0, "spatial tile must be a multiple of 128"
        grid_s = pl.cdiv(HW, ts_eff)

    out3 = pl.pallas_call(
        _group_pointwise_kernel,
        out_shape=jax.ShapeDtypeStruct((B, N, HW), x3.dtype),
        grid_spec=pl.GridSpec(
            grid=(B, grid_s),
            in_specs=[
                pl.BlockSpec((1, C, ts_eff), lambda b, s: (b, 0, s)),
                pl.BlockSpec((N, C), lambda b, s: (0, 0)),
            ],
            out_specs=pl.BlockSpec((1, N, ts_eff), lambda b, s: (b, 0, s)),
        ),
        compiler_params=pltpu.CompilerParams(
            dimension_semantics=("parallel", "parallel"),
        ),
    )(x3, wt)

    # Layout glue left to XLA / the consumer (p=8 minor dim would force
    # masked stores if written from the kernel):
    # (B, N, HW) -> (B, n_heads, p, H, W) -> (B, n_heads, H, W, p)
    out = out3.reshape(B, n_heads, p, H, W)
    return jnp.transpose(out, (0, 1, 3, 4, 2))


if __name__ == "__main__":
    # Module config: in_dim=32, n_heads=4, proj_factor=1 -> proj_ch=32, p=8
    B, C, H, W = 2, 32, 16, 16
    n_heads, proj_factor = 4, 1
    proj_ch = C // proj_factor
    p = proj_ch // n_heads

    key = jax.random.PRNGKey(0)
    kx, kw = jax.random.split(key)
    x = jax.random.normal(kx, (B, C, H, W), dtype=jnp.float32)
    # deterministic init matching nn.init.normal_(w, std=0.01)
    w = 0.01 * jax.random.normal(kw, (C, n_heads, p), dtype=jnp.float32)

    out = group_pointwise(x, w)
    out = jax.block_until_ready(out)

    # reference check against plain-JAX einsum (same semantics as PyTorch)
    x_nhwc = jnp.transpose(x, (0, 2, 3, 1))
    ref = jnp.einsum("bhwc,cnp->bnhwp", x_nhwc, w)
    assert out.shape == (B, n_heads, H, W, p), out.shape
    assert jnp.allclose(out, ref, atol=1e-5, rtol=1e-5)

    print("KERNEL_OK")
</pallas_src>

<mosaic_0001>
module attributes {stable_mosaic.version = 11 : i64} {
  func.func @_group_pointwise_kernel(%arg0: i32, %arg1: i32, %arg2: memref<1x32x256xf32, #tpu.memory_space<vmem>>, %arg3: memref<32x32xf32, #tpu.memory_space<vmem>>, %arg4: memref<1x32x256xf32, #tpu.memory_space<vmem>>) attributes {dimension_semantics = [#tpu.dimension_semantics<parallel>, #tpu.dimension_semantics<parallel>], iteration_bounds = array<i64: 2, 1>, scalar_prefetch = 0 : i64, scratch_operands = 0 : i64, tpu.core_type = #tpu.core_type<tc>, window_params = [{transform_indices = @transform_0, window_bounds = array<i64: 1, 32, 256>}, {pipeline_mode = #tpu.pipeline_mode<synchronous>, transform_indices = @transform_1, window_bounds = array<i64: 32, 32>}, {transform_indices = @transform_2, window_bounds = array<i64: 1, 32, 256>}]} {
    %c0 = arith.constant 0 : index
    %c0_0 = arith.constant 0 : index
    %0 = vector.load %arg3[%c0, %c0_0] : memref<32x32xf32, #tpu.memory_space<vmem>>, vector<32x32xf32>
    %c0_1 = arith.constant 0 : index
    %c0_2 = arith.constant 0 : index
    %c0_3 = arith.constant 0 : index
    %1 = vector.load %arg2[%c0_1, %c0_2, %c0_3] : memref<1x32x256xf32, #tpu.memory_space<vmem>>, vector<1x32x256xf32>
    %2 = vector.shape_cast %1 : vector<1x32x256xf32> to vector<32x256xf32>
    %cst = arith.constant dense<0.000000e+00> : vector<32x256xf32>
    %3 = tpu.matmul %0, %2, %cst {dimension_numbers = #tpu.dot_dimension_numbers<[1], [0], [0], [1], [0, 0, 1, 1], [], []>} : vector<32x32xf32>, vector<32x256xf32>, vector<32x256xf32> -> vector<32x256xf32>
    %c0_4 = arith.constant 0 : index
    %c0_5 = arith.constant 0 : index
    %c0_6 = arith.constant 0 : index
    %4 = vector.load %arg4[%c0_4, %c0_5, %c0_6] : memref<1x32x256xf32, #tpu.memory_space<vmem>>, vector<1x32x256xf32>
    %5 = vector.shape_cast %4 : vector<1x32x256xf32> to vector<32x256xf32>
    %6 = vector.shape_cast %3 : vector<32x256xf32> to vector<1x32x256xf32>
    tpu.vector_store %arg4[%c0_4, %c0_5, %c0_6], %6 {strides = array<i32>} : memref<1x32x256xf32, #tpu.memory_space<vmem>>, vector<1x32x256xf32>,
    return
  }
  func.func @transform_0(%arg0: i32, %arg1: i32) -> (i32, i32, i32) {
    %c0_i32 = arith.constant 0 : i32
    %c0_i32_0 = arith.constant 0 : i32
    return %arg0, %c0_i32, %arg1 : i32, i32, i32
  }
  func.func @transform_1(%arg0: i32, %arg1: i32) -> (i32, i32) {
    %c0_i32 = arith.constant 0 : i32
    %c0_i32_0 = arith.constant 0 : i32
    %c0_i32_1 = arith.constant 0 : i32
    return %c0_i32, %c0_i32_0 : i32, i32
  }
  func.func @transform_2(%arg0: i32, %arg1: i32) -> (i32, i32, i32) {
    %c0_i32 = arith.constant 0 : i32
    %c0_i32_0 = arith.constant 0 : i32
    return %arg0, %c0_i32, %arg1 : i32, i32, i32
  }
}

</mosaic_0001>

<bundles_post_ra>
// kernel: group_pointwise.1
= control target key start
LH: loop header
LB: loop body
LE: loop exit
PB: predicated region body
PF: predicated region fallthrough
CT: control target
= control target key end

     0   :  { %s486_s9 = smov 0   ;;  %s488_s10 = smov 0   ;;  %s538_s0 = inlined_call_operand.vmem [shape: f32[2,32,256], index: 0, kind: input, shape index: {}]   ;;  %s539_s1 = inlined_call_operand.vmem [shape: f32[32,32], index: 1, kind: input, shape index: {}]   ;;  %s540_s2 = inlined_call_operand.vmem [shape: f32[2,32,256], index: 2, kind: output, shape index: {}]  }
   0x1   :  { %s490_s11 = smov 0  }
   0x2 LB: > { %s24_s12 = sadd.s32 1, %s464_s10  ;;  %p396_p0 = scmp.ge.s32.totalorder %s468_s11, 1  ;;  %s468_s11 = sphi %s490_s11, %s12_s11   ;;  %s464_s10 = sphi %s488_s10, %s542_s10   ;;  %s460_s9 = sphi %s486_s9, %s541_s9  }
   0x3   : > { %p26_p1 = scmp.ge.s32.totalorder %s24_s12, 2  ;;  %p133_p2 = scmp.lt.s32.totalorder %s468_s11, 3 }
   0x5   : > { %s544_s12 = smov (%p26_p1, %s24_s12), 0  ;;  %p134_p3 = pnand %p396_p0, %p133_p2 }
   0x6   : > { %p164_p4 = scmp.lt.s32.totalorder (!%p134_p3), %s460_s9, 1  ;;  %v470_v0 = vmov (!%p134_p3), 0.0   ;;  %v183_v13 = vld [vmem:[%s539_s1] sm:$0xff] (!%p134_p3)  ;;  %vm195_vm0 = vcmask (!%p134_p3), 261120   ;;  %v185_v14 = vld [vmem:[%s539_s1 + $0x10] sm:$0xff] (!%p134_p3)  ;;  %v184_v15 = vld [vmem:[%s539_s1 + $0x8] sm:$0xff] (!%p134_p3) }
   0x7   : > { %137 = sbr.rel (%p134_p3) target bundleno = 246 (0xf6), region = 28  ;;  %272 = vmatprep.mubr.f32.mxu0 (!%p134_p3), %v470_v0  ;;  %284 = vmatprep.mubr.f32.mxu1 (!%p134_p3), %v470_v0  ;;  %v186_v16 = vld [vmem:[%s539_s1 + $0x18] sm:$0xff] (!%p134_p3) }
   0xe   : > { %s546_s9 = smov (!%p164_p4, %s460_s9), 1 }
   0xf   : > { %s407_s13 = sshll.u32 %s546_s9, 6 }
  0x10   : > { %s171_s16 = scalar_lea.vmem %s538_s0, %s407_s13  ;;  %s181_s27 = scalar_lea.vmem %s540_s2, %s407_s13 }
  0x11   : > { %v188_v1 = vld [vmem:[%s171_s16 + $0x8] sm:$0xff]  ;;  %v190_v2 = vld [vmem:[%s171_s16 + $0x18] sm:$0xff]  ;;  %v187_v3 = vld [vmem:[%s171_s16] sm:$0xff] }
  0x12   : > { %v409_v4 = vpack.c.bf16 %v190_v2, %v188_v1  ;;  %v189_v5 = vld [vmem:[%s171_s16 + $0x10] sm:$0xff]  ;;  %v192_v6 = vld [vmem:[%s171_s16 + $0x28] sm:$0xff]  ;;  %v194_v7 = vld [vmem:[%s171_s16 + $0x38] sm:$0xff] }
  0x13   : > { %v411_v8 = vpack.c.bf16 %v189_v5, %v187_v3  ;;  %v413_v9 = vpack.c.bf16 %v194_v7, %v192_v6  ;;  %v191_v10 = vld [vmem:[%s171_s16 + $0x20] sm:$0xff]  ;;  %v193_v11 = vld [vmem:[%s171_s16 + $0x30] sm:$0xff] }
  0x14   : > { %410 = vmatprep.subr.bf16.mxu0 %v409_v4  ;;  %417 = vmatprep.subr.bf16.mxu1 %v409_v4  ;;  %v415_v12 = vpack.c.bf16 %v193_v11, %v191_v10 }
  0x15   : > { %412 = vmatpush1.bf16.msra.mxu0 %v411_v8  ;;  %419 = vmatpush1.bf16.msra.mxu1 %v411_v8 }
  0x16   : > { %414 = vmatprep.subr.bf16.mxu0 %v413_v9  ;;  %418 = vmatprep.subr.bf16.mxu1 %v413_v9 }
  0x19   : > { %416 = vmatpush1.bf16.msra.mxu0 %v415_v12  ;;  %420 = vmatpush1.bf16.msra.mxu1 %v415_v12 }
  0x1c   : > { %401 = vmatmul.mubr.msk.f32.vlgmr.msra.gmra.mrb[0].mxu0 %vm195_vm0, %v183_v13  ;;  %403 = vmatmul.mubr.msk.f32.vlgmr.msra.gmra.mrb[0].mxu1 %vm195_vm0, %v185_v14 }
  0x1d   : > { %278 = vmatprep.mubr.f32.mxu0 %v470_v0  ;;  %290 = vmatprep.mubr.f32.mxu1 %v470_v0 }
  0x20   : > { %402 = vmatmul.mubr.msk.f32.gmra.mrb[2].mxu0 %vm195_vm0, %v184_v15  ;;  %404 = vmatmul.mubr.msk.f32.gmra.mrb[2].mxu1 %vm195_vm0, %v186_v16 }
  0xef   : > { %v274_v17 = vpop.f32.mrb[0].mxu0  ;;  %v286_v18 = vpop.f32.mrb[0].mxu1 }
  0xf0   : > { %297 = vst [vmem:[%s181_s27] sm:$0xff] %v274_v17  ;;  %301 = vst [vmem:[%s181_s27 + $0x20] sm:$0xff] %v286_v18  ;;  %v276_v19 = vpop.f32.mrb[1].mxu0  ;;  %v288_v20 = vpop.f32.mrb[1].mxu1 }
  0xf1   : > { %298 = vst [vmem:[%s181_s27 + $0x8] sm:$0xff] %v276_v19  ;;  %302 = vst [vmem:[%s181_s27 + $0x28] sm:$0xff] %v288_v20 }
  0xf3   : > { %v280_v21 = vpop.f32.mrb[2].mxu0  ;;  %v292_v22 = vpop.f32.mrb[2].mxu1 }
  0xf4   : > { %299 = vst [vmem:[%s181_s27 + $0x10] sm:$0xff] %v280_v21  ;;  %303 = vst [vmem:[%s181_s27 + $0x30] sm:$0xff] %v292_v22  ;;  %v282_v23 = vpop.f32.mrb[3].mxu0  ;;  %v294_v24 = vpop.f32.mrb[3].mxu1 }
  0xf5   : > { %300 = vst [vmem:[%s181_s27 + $0x18] sm:$0xff] %v282_v23  ;;  %304 = vst [vmem:[%s181_s27 + $0x38] sm:$0xff] %v294_v24 }
  0xf6 PF: > { %s12_s11 = sadd.s32 1, %s468_s11   ;;  %s541_s9 = smov %s464_s10 }
  0xf7   : > { %p9_p5 = scmp.ge.s32.totalorder %s12_s11, 4   ;;  %s542_s10 = smov %s544_s12 }
  0xf9   :  { %11 = sbr.rel (!%p9_p5) target bundleno = 2 (0x2), region = 58 }

</bundles_post_ra>
